<compile_context>
chip_gen: v5e
topology: v5e:2x2
jax: 0.10.0
libtpu: 0.0.40
codegen_flags: <defaults>
</compile_context>

<pallas_src>
import jax
import jax.numpy as jnp
from jax.experimental import pallas as pl
from jax.experimental.pallas import tpu as pltpu

SUBLANE = 8
LANE = 128


def _round_up(v, m):
    return ((v + m - 1) // m) * m


def fused_linear_kernel(x_ref, w_ref, b_ref, o_ref):
    # Single fused GEMM: y = x @ (W1@W2) + (b1@W2 + b2), f32 accumulation.
    o_ref[...] = (
        jnp.dot(x_ref[...], w_ref[...], preferred_element_type=jnp.float32)
        + b_ref[...]
    ).astype(o_ref.dtype)


def vuf_odhadovac_forward(x, w1, b1, w2, b2, *, tile_b=512):
    """Pallas TPU implementation of VUF_odhadovac.forward.

    x:  (B, n_input)      float32
    w1: (n_input, h1)     float32   (transposed vs torch Linear weight)
    b1: (1, h1)           float32
    w2: (h1, n_output)    float32
    b2: (1, n_output)     float32
    returns (B, n_output) float32
    """
    B, n_in = x.shape
    n_out = w2.shape[1]

    # --- Algebraic fusion at trace time (valid: no activation in between). ---
    w_fused = jnp.dot(w1, w2, preferred_element_type=jnp.float32)          # (n_in, n_out)
    b_fused = jnp.dot(b1, w2, preferred_element_type=jnp.float32) + b2     # (1, n_out)

    # --- Lane-dense output: pad fused output dim to a multiple of 128. ---
    n_out_p = _round_up(n_out, LANE)
    if n_out_p != n_out:
        w_fused = jnp.pad(w_fused, ((0, 0), (0, n_out_p - n_out)))
        b_fused = jnp.pad(b_fused, ((0, 0), (0, n_out_p - n_out)))

    # --- Batch tiling: big tiles, but >= 2 grid steps when possible. ---
    b_pad8 = _round_up(B, SUBLANE)
    tb = min(tile_b, b_pad8)
    if tb == b_pad8 and b_pad8 >= 2 * SUBLANE:
        # Split a single-tile batch into two tiles so a parallel grid axis
        # exists for v7x's dual TensorCores.
        tb = _round_up(b_pad8 // 2, SUBLANE)
    B_pad = _round_up(B, tb)
    if B_pad != B:
        x = jnp.pad(x, ((0, B_pad - B), (0, 0)))

    grid = (B_pad // tb,)

    cost = pl.CostEstimate(
        flops=2 * B_pad * n_in * n_out_p,
        transcendentals=0,
        bytes_accessed=4 * (B_pad * n_in + n_in * n_out_p + n_out_p
                            + B_pad * n_out_p),
    )

    out_padded = pl.pallas_call(
        fused_linear_kernel,
        out_shape=jax.ShapeDtypeStruct((B_pad, n_out_p), x.dtype),
        grid=grid,
        in_specs=[
            pl.BlockSpec((tb, n_in), lambda i: (i, 0)),        # x tile
            pl.BlockSpec((n_in, n_out_p), lambda i: (0, 0)),   # fused W (resident)
            pl.BlockSpec((1, n_out_p), lambda i: (0, 0)),      # fused b (resident)
        ],
        out_specs=pl.BlockSpec((tb, n_out_p), lambda i: (i, 0)),
        compiler_params=pltpu.CompilerParams(
            dimension_semantics=("parallel",)),
        cost_estimate=cost,
    )(x, w_fused, b_fused)

    # Slice off batch + lane padding.
    return out_padded[:B, :n_out]


if __name__ == "__main__":
    # Module config: n_input_layers, n_output_layers, h1 (h2/h3/h4 are unused
    # by the reference module's forward — it only builds Linear(n_in, h1) and
    # Linear(h1, n_out)).
    n_input_layers = 32
    n_output_layers = 16
    h1 = 64
    batch = 256  # moderate batch so the grid has 2 parallel steps

    key = jax.random.PRNGKey(0)
    k_x, k_w1, k_b1, k_w2, k_b2 = jax.random.split(key, 5)

    x = jax.random.normal(k_x, (batch, n_input_layers), dtype=jnp.float32)
    # Deterministic synthetic parameters (uniform, roughly torch default scale).
    w1 = jax.random.uniform(k_w1, (n_input_layers, h1), jnp.float32,
                            minval=-1.0, maxval=1.0) / jnp.sqrt(n_input_layers)
    b1 = jax.random.uniform(k_b1, (1, h1), jnp.float32,
                            minval=-1.0, maxval=1.0) / jnp.sqrt(n_input_layers)
    w2 = jax.random.uniform(k_w2, (h1, n_output_layers), jnp.float32,
                            minval=-1.0, maxval=1.0) / jnp.sqrt(h1)
    b2 = jax.random.uniform(k_b2, (1, n_output_layers), jnp.float32,
                            minval=-1.0, maxval=1.0) / jnp.sqrt(h1)

    out = vuf_odhadovac_forward(x, w1, b1, w2, b2)
    out = jax.block_until_ready(out)

    # Pure-JAX reference check (same semantics as the PyTorch forward, unfused).
    ref = (x @ w1 + b1) @ w2 + b2
    assert out.shape == (batch, n_output_layers)
    assert jnp.allclose(out, ref, atol=1e-4, rtol=1e-4)

    # Also sanity-check a ragged batch (not divisible by the tile).
    x_r = x[:37]
    out_r = jax.block_until_ready(vuf_odhadovac_forward(x_r, w1, b1, w2, b2))
    assert out_r.shape == (37, n_output_layers)
    assert jnp.allclose(out_r, ref[:37], atol=1e-4, rtol=1e-4)

    print("KERNEL_OK")
</pallas_src>

<mosaic_0001>
module attributes {stable_mosaic.version = 11 : i64} {
  func.func @fused_linear_kernel(%arg0: i32, %arg1: memref<128x32xf32, #tpu.memory_space<vmem>>, %arg2: memref<32x128xf32, #tpu.memory_space<vmem>>, %arg3: memref<1x128xf32, #tpu.memory_space<vmem>>, %arg4: memref<128x128xf32, #tpu.memory_space<vmem>>) attributes {dimension_semantics = [#tpu.dimension_semantics<parallel>], iteration_bounds = array<i64: 2>, scalar_prefetch = 0 : i64, scratch_operands = 0 : i64, tpu.core_type = #tpu.core_type<tc>, window_params = [{transform_indices = @transform_0, window_bounds = array<i64: 128, 32>}, {pipeline_mode = #tpu.pipeline_mode<synchronous>, transform_indices = @transform_1, window_bounds = array<i64: 32, 128>}, {pipeline_mode = #tpu.pipeline_mode<synchronous>, transform_indices = @transform_2, window_bounds = array<i64: 1, 128>}, {transform_indices = @transform_3, window_bounds = array<i64: 128, 128>}]} {
    %c0 = arith.constant 0 : index
    %c0_0 = arith.constant 0 : index
    %0 = vector.load %arg1[%c0, %c0_0] : memref<128x32xf32, #tpu.memory_space<vmem>>, vector<128x32xf32>
    %c0_1 = arith.constant 0 : index
    %c0_2 = arith.constant 0 : index
    %1 = vector.load %arg2[%c0_1, %c0_2] : memref<32x128xf32, #tpu.memory_space<vmem>>, vector<32x128xf32>
    %cst = arith.constant dense<0.000000e+00> : vector<128x128xf32>
    %2 = tpu.matmul %0, %1, %cst {dimension_numbers = #tpu.dot_dimension_numbers<[1], [0], [0], [1], [0, 0, 1, 1], [], []>} : vector<128x32xf32>, vector<32x128xf32>, vector<128x128xf32> -> vector<128x128xf32>
    %c0_3 = arith.constant 0 : index
    %c0_4 = arith.constant 0 : index
    %3 = vector.load %arg3[%c0_3, %c0_4] : memref<1x128xf32, #tpu.memory_space<vmem>>, vector<1x128xf32>
    %4 = vector.broadcast %3 : vector<1x128xf32> to vector<128x128xf32>
    %5 = arith.addf %2, %4 : vector<128x128xf32>
    %c0_5 = arith.constant 0 : index
    %c0_6 = arith.constant 0 : index
    %6 = vector.load %arg4[%c0_5, %c0_6] : memref<128x128xf32, #tpu.memory_space<vmem>>, vector<128x128xf32>
    tpu.vector_store %arg4[%c0_5, %c0_6], %5 {strides = array<i32>} : memref<128x128xf32, #tpu.memory_space<vmem>>, vector<128x128xf32>,
    return
  }
  func.func @transform_0(%arg0: i32) -> (i32, i32) {
    %c0_i32 = arith.constant 0 : i32
    %c0_i32_0 = arith.constant 0 : i32
    return %arg0, %c0_i32 : i32, i32
  }
  func.func @transform_1(%arg0: i32) -> (i32, i32) {
    %c0_i32 = arith.constant 0 : i32
    %c0_i32_0 = arith.constant 0 : i32
    %c0_i32_1 = arith.constant 0 : i32
    return %c0_i32, %c0_i32_0 : i32, i32
  }
  func.func @transform_2(%arg0: i32) -> (i32, i32) {
    %c0_i32 = arith.constant 0 : i32
    %c0_i32_0 = arith.constant 0 : i32
    %c0_i32_1 = arith.constant 0 : i32
    return %c0_i32, %c0_i32_0 : i32, i32
  }
  func.func @transform_3(%arg0: i32) -> (i32, i32) {
    %c0_i32 = arith.constant 0 : i32
    %c0_i32_0 = arith.constant 0 : i32
    return %arg0, %c0_i32 : i32, i32
  }
}

</mosaic_0001>

<bundles_post_ra>
// kernel: tpu_custom_call.1
= control target key start
LH: loop header
LB: loop body
LE: loop exit
PB: predicated region body
PF: predicated region fallthrough
CT: control target
= control target key end

     0   :  { %8 = vsyncpa [#allocation3], 0  ;;  %s729_s0 = inlined_call_operand.vmem [shape: f32[256,32], index: 0, kind: input, shape index: {}]   ;;  %s730_s1 = inlined_call_operand.vmem [shape: f32[32,128], index: 1, kind: input, shape index: {}]   ;;  %s731_s2 = inlined_call_operand.vmem [shape: f32[1,128], index: 2, kind: input, shape index: {}]   ;;  %s732_s3 = inlined_call_operand.hbm [shape: f32[256,128], index: 3, kind: output, shape index: {}]  }
   0x1   :  { %10 = vsyncpa [#allocation3 + $0x1], 0  ;;  %s573_s12 = smov 0   ;;  %s575_s13 = smov 0  }
   0x2   :  { %s577_s14 = smov 0   ;;  %s579_s15 = smov 0  }
   0x3 LB: > { %s594_s16 = sadd.s32 4294967295, %s549_s15   ;;  %s404_s17 = sadd.s32 4294967294, %s549_s15   ;;  %s549_s15 = sphi %s579_s15, %s738_s15   ;;  %s545_s14 = sphi %s577_s14, %s737_s14   ;;  %s541_s13 = sphi %s575_s13, %s736_s13   ;;  %s537_s12 = sphi %s573_s12, %s735_s12  }
   0x4   : > { %s598_s18 = sadd.s32 1, %s549_s15   ;;  %s91_s19 = sadd.s32 1, %s545_s14 }
   0x5   : > { %s88_s20 = ssub.s32 %s549_s15, %s598_s18  ;;  %p101_p0 = scmp.ne.s32.totalorder %s545_s14, %s541_s13 }
   0x6   : > { %p89_p1 = scmp.eq.s32.totalorder %s88_s20, 0  ;;  %p102_p2 = scmp.eq.s32.totalorder %s594_s16, 1 }
   0x7   : > { %p107_p3 = scmp.ne.s32.totalorder %s541_s13, %s537_s12  ;;  %p108_p4 = scmp.eq.s32.totalorder %s404_s17, 1 }
   0x8   : > { %s609_s21 = scalar_select %p89_p1, %s545_s14, %s91_s19  }
   0x9   : > { %p611_p5 = por %p102_p2, %p101_p0  ;;  %p615_p6 = por %p108_p4, %p107_p3 }
   0xa   : > { %p407_p7 = scmp.ge.s32.totalorder %s549_s15, 1  ;;  %p141_p8 = scmp.lt.s32.totalorder %s549_s15, 3 }
   0xc   : > { %p142_p9 = pnand %p407_p7, %p141_p8 }
   0xd   : > { %s409_s28 = sshll.u32 (!%p142_p9), %s594_s16, 4  ;;  %s162_s10 = sand.u32 (!%p142_p9), 1, %s541_s13  }
   0xe   : > { %145 = sbr.rel (%p142_p9) target bundleno = 190 (0xbe), region = 32  ;;  %p166_p10 = scmp.lt.s32.totalorder (!%p142_p9), %s409_s28, 31 }
   0xf   : > { %s408_s11 = sshll.u32 (!%p142_p9), %s162_s10, 7  ;;  %s432_s24 = sshll.u32 (!%p142_p9), %s594_s16, 7 }
  0x10   : > { %s677_s20 = scalar_lea.vmem (!%p142_p9), [#allocation2], %s408_s11  ;;  %s338_s27 = scalar_lea.hbm (!%p142_p9), %s732_s3, %s432_s24 }
  0x11   : > { %s341_s29 = sshll.u32 (!%p142_p9), %s338_s27, 4  ;;  %s327_s16 = scalar_lea.sflag (!%p142_p9), [#allocation3], %s162_s10  ;;  %s342_s29 = int_to_ptr.hbm [resolvable:$true] %s341_s29 }
  0x12   : > { %s501_s30 = sshra.s32 (!%p142_p9), %s342_s29, 4  ;;  %s507_s7 = scalar_lea.hbm (!%p142_p9), %s732_s3, 256  ;;  %s502_s30 = int_to_ptr.hbm [resolvable:$true] %s501_s30 }
  0x13   : > { %v191_v0 = vld [vmem:[%s730_s1 + $0x18] sm:$0xff]  ;;  %v190_v1 = vld [vmem:[%s730_s1 + $0x10] sm:$0xff]  ;;  %v189_v2 = vld [vmem:[%s730_s1 + $0x8] sm:$0xff]  ;;  %s740_s28 = smov (!%p166_p10, %s409_s28), 31  ;;  %vm196_vm0 = vcmask 261120   ;;  %s503_s4 = scalar_lea.hbm %s502_s30, 128 }
  0x14   : > { %434 = vmatpush.msra.mxu2 %v191_v0  ;;  %435 = vmatpush.msra.mxu3 %v191_v0  ;;  %v188_v3 = vld [vmem:[%s730_s1] sm:$0xff]  ;;  %s410_s6 = sshll.u32 %s740_s28, 3  ;;  %s339_s28 = sshll.u32 %s677_s20, 4  ;;  %s340_s28 = int_to_ptr.vmem [resolvable:$true] %s339_s28 }
  0x15   : > { %257 = vmatpush.msra.mxu0 %v191_v0  ;;  %433 = vmatpush.msra.mxu1 %v191_v0  ;;  %s637_s9 = scalar_lea.vmem %s729_s0, %s410_s6  ;;  %v486_v20 = vld [vmem:[%s731_s2] ss:$0 sm:$0xff]  ;;  %p504_p11 = scmp.ne.s32.totalorder %s502_s30, %s503_s4 }
  0x16   : > { %437 = vmatpush.msra.mxu2 %v190_v1  ;;  %438 = vmatpush.msra.mxu3 %v190_v1  ;;  %v180_v4 = vld [vmem:[%s637_s9 + $0x40] sm:$0xff]  ;;  %v181_v8 = vld [vmem:[%s637_s9 + $0x48] sm:$0xff]  ;;  %v182_v12 = vld [vmem:[%s637_s9 + $0x50] sm:$0xff]  ;;  %p508_p0 = scmp.lt.s32.totalorder %s502_s30, %s732_s3  ;;  %p509_p1 = scmp.lt.s32.totalorder %s507_s7, %s503_s4 }
  0x17   : > { %258 = vmatpush.msra.mxu0 %v190_v1  ;;  %436 = vmatpush.msra.mxu1 %v190_v1  ;;  %v184_v5 = vld [vmem:[%s637_s9 + $0x60] sm:$0xff]  ;;  %v185_v9 = vld [vmem:[%s637_s9 + $0x68] sm:$0xff]  ;;  %v186_v13 = vld [vmem:[%s637_s9 + $0x70] sm:$0xff]  ;;  %p505_p12 = pnand %p504_p11, %p611_p5 }
  0x18   : > { %440 = vmatpush.msra.mxu2 %v189_v2  ;;  %441 = vmatpush.msra.mxu3 %v189_v2  ;;  %v172_v6 = vld [vmem:[%s637_s9] sm:$0xff]  ;;  %v173_v10 = vld [vmem:[%s637_s9 + $0x8] sm:$0xff]  ;;  %v174_v14 = vld [vmem:[%s637_s9 + $0x10] sm:$0xff]  ;;  %p510_p2 = por %p509_p1, %p508_p0 }
  0x19   : > { %259 = vmatpush.msra.mxu0 %v189_v2  ;;  %439 = vmatpush.msra.mxu1 %v189_v2  ;;  %v176_v7 = vld [vmem:[%s637_s9 + $0x20] sm:$0xff]  ;;  %v177_v11 = vld [vmem:[%s637_s9 + $0x28] sm:$0xff]  ;;  %v178_v15 = vld [vmem:[%s637_s9 + $0x30] sm:$0xff]  ;;  %p506_p13 = pneg %p505_p12 }
  0x1a   : > { %443 = vmatpush.msra.mxu2 %v188_v3  ;;  %444 = vmatpush.msra.mxu3 %v188_v3  ;;  %v183_v16 = vld [vmem:[%s637_s9 + $0x58] sm:$0xff] }
  0x1b   : > { %419 = vmatmul.msk.f32.vlgmr.msra.gmra.mxu2 %vm196_vm0, %v180_v4  ;;  %423 = vmatmul.msk.f32.vlgmr.msra.gmra.mxu3 %vm196_vm0, %v184_v5  ;;  %v187_v17 = vld [vmem:[%s637_s9 + $0x78] sm:$0xff]  ;;  %p511_p3 = pnand %p510_p2, %p506_p13 }
  0x1c   : > { %260 = vmatpush.msra.mxu0 %v188_v3  ;;  %442 = vmatpush.msra.mxu1 %v188_v3  ;;  %v175_v18 = vld [vmem:[%s637_s9 + $0x18] sm:$0xff] }
  0x1d   : > { %411 = vmatmul.msk.f32.vlgmr.msra.gmra.mxu0 %vm196_vm0, %v172_v6  ;;  %415 = vmatmul.msk.f32.vlgmr.msra.gmra.mxu1 %vm196_vm0, %v176_v7  ;;  %v179_v19 = vld [vmem:[%s637_s9 + $0x38] sm:$0xff] }
  0x23   : > { %420 = vmatmul.msk.f32.gmra.mxu2 %vm196_vm0, %v181_v8  ;;  %424 = vmatmul.msk.f32.gmra.mxu3 %vm196_vm0, %v185_v9 }
  0x25   : > { %412 = vmatmul.msk.f32.gmra.mxu0 %vm196_vm0, %v173_v10  ;;  %416 = vmatmul.msk.f32.gmra.mxu1 %vm196_vm0, %v177_v11 }
  0x2b   : > { %421 = vmatmul.msk.f32.gmra.mxu2 %vm196_vm0, %v182_v12  ;;  %425 = vmatmul.msk.f32.gmra.mxu3 %vm196_vm0, %v186_v13 }
  0x2d   : > { %413 = vmatmul.msk.f32.gmra.mxu0 %vm196_vm0, %v174_v14  ;;  %417 = vmatmul.msk.f32.gmra.mxu1 %vm196_vm0, %v178_v15 }
  0x33   : > { %422 = vmatmul.msk.f32.gmra.mxu2 %vm196_vm0, %v183_v16  ;;  %426 = vmatmul.msk.f32.gmra.mxu3 %vm196_vm0, %v187_v17 }
  0x35   : > { %414 = vmatmul.msk.f32.gmra.mxu0 %vm196_vm0, %v175_v18  ;;  %418 = vmatmul.msk.f32.gmra.mxu1 %vm196_vm0, %v179_v19 }
  0x9a   : > { %v262_v21 = vpop.f32.mrf.mxu0  ;;  %v274_v22 = vpop.f32.mrf.mxu1 }
  0x9b   : > { %v263_v23 = vadd.f32 %v486_v20, %v262_v21  ;;  %v275_v24 = vadd.f32 %v486_v20, %v274_v22 }
  0x9d   : > { %310 = vst [vmem:[%s677_s20] sm:$0xff] %v263_v23 }
  0x9e   : > { %314 = vst [vmem:[%s677_s20 + $0x20] sm:$0xff] %v275_v24  ;;  %v286_v25 = vpop.f32.mrf.mxu2  ;;  %v298_v26 = vpop.f32.mrf.mxu3 }
  0x9f   : > { %v287_v27 = vadd.f32 %v486_v20, %v286_v25  ;;  %v299_v28 = vadd.f32 %v486_v20, %v298_v26 }
  0xa1   : > { %318 = vst [vmem:[%s677_s20 + $0x40] sm:$0xff] %v287_v27 }
  0xa2   : > { %322 = vst [vmem:[%s677_s20 + $0x60] sm:$0xff] %v299_v28  ;;  %v265_v29 = vpop.f32.mrf.mxu0  ;;  %v277_v30 = vpop.f32.mrf.mxu1 }
  0xa3   : > { %v266_v31 = vadd.f32 %v486_v20, %v265_v29  ;;  %v278_v32 = vadd.f32 %v486_v20, %v277_v30 }
  0xa5   : > { %311 = vst [vmem:[%s677_s20 + $0x8] sm:$0xff] %v266_v31 }
  0xa6   : > { %315 = vst [vmem:[%s677_s20 + $0x28] sm:$0xff] %v278_v32  ;;  %v289_v33 = vpop.f32.mrf.mxu2  ;;  %v301_v34 = vpop.f32.mrf.mxu3 }
  0xa7   : > { %v290_v35 = vadd.f32 %v486_v20, %v289_v33  ;;  %v302_v36 = vadd.f32 %v486_v20, %v301_v34 }
  0xa9   : > { %319 = vst [vmem:[%s677_s20 + $0x48] sm:$0xff] %v290_v35 }
  0xaa   : > { %323 = vst [vmem:[%s677_s20 + $0x68] sm:$0xff] %v302_v36  ;;  %v268_v37 = vpop.f32.mrf.mxu0  ;;  %v280_v38 = vpop.f32.mrf.mxu1 }
  0xab   : > { %v269_v39 = vadd.f32 %v486_v20, %v268_v37  ;;  %v281_v40 = vadd.f32 %v486_v20, %v280_v38 }
  0xad   : > { %312 = vst [vmem:[%s677_s20 + $0x10] sm:$0xff] %v269_v39 }
  0xae   : > { %316 = vst [vmem:[%s677_s20 + $0x30] sm:$0xff] %v281_v40  ;;  %v292_v41 = vpop.f32.mrf.mxu2  ;;  %v304_v42 = vpop.f32.mrf.mxu3 }
  0xaf   : > { %v293_v43 = vadd.f32 %v486_v20, %v292_v41  ;;  %v305_v44 = vadd.f32 %v486_v20, %v304_v42 }
  0xb1   : > { %320 = vst [vmem:[%s677_s20 + $0x50] sm:$0xff] %v293_v43 }
  0xb2   : > { %324 = vst [vmem:[%s677_s20 + $0x70] sm:$0xff] %v305_v44  ;;  %v271_v45 = vpop.f32.mrf.mxu0  ;;  %v283_v46 = vpop.f32.mrf.mxu1 }
  0xb3   : > { %v272_v47 = vadd.f32 %v486_v20, %v271_v45  ;;  %v284_v48 = vadd.f32 %v486_v20, %v283_v46 }
  0xb5   : > { %313 = vst [vmem:[%s677_s20 + $0x18] sm:$0xff] %v272_v47 }
  0xb6   : > { %317 = vst [vmem:[%s677_s20 + $0x38] sm:$0xff] %v284_v48  ;;  %v295_v49 = vpop.f32.mrf.mxu2  ;;  %v307_v50 = vpop.f32.mrf.mxu3 }
  0xb7   : > { %v296_v51 = vadd.f32 %v486_v20, %v295_v49  ;;  %v308_v52 = vadd.f32 %v486_v20, %v307_v50 }
  0xb9   : > { %321 = vst [vmem:[%s677_s20 + $0x58] sm:$0xff] %v296_v51 }
  0xba   : > { %325 = vst [vmem:[%s677_s20 + $0x78] sm:$0xff] %v308_v52 }
  0xbb   : > { %514 = shalt.err (!%p511_p3)
}
  0xbc   : > { %s551_s10 = smov 128   ;;  %s552_s11 = smov 8  }
  0xbd   : > { %445 = dma.vmem_to_hbm [thread:$0]  (%p611_p5), %s340_s28, 2048, %s342_s29, %s327_s16, %s551_s10, %s551_s10, %s552_s11  }
  0xbe PF: > { %p451_p4 = scmp.ge.s32.totalorder %s549_s15, 2  ;;  %s356_s17 = sand.u32 1, %s537_s12  }
  0xbf   : > { %s357_s19 = scalar_lea.sflag [#allocation3], %s356_s17 }
  0xc0   : > { %p448_p7 = pnand %p451_p4, %p615_p6 }
  0xc2   : > { %p449_p8 = pneg %p448_p7 }
  0xc4   : > { %532 = dma.done.wait (%p449_p8), %s357_s19, 2048  }
  0xc5   : > { %534 = vsyncadd (%p449_p8), %s357_s19, 4294965248  ;;  %p13_p9 = scmp.ge.s32.totalorder %s598_s18, 4   ;;  %s735_s12 = smov %s541_s13 }
  0xc6   : > { %s736_s13 = smov %s545_s14  ;;  %s737_s14 = smov %s609_s21 }
  0xc7   : > { %s738_s15 = smov %s598_s18  ;;  %15 = sbr.rel (!%p13_p9) target bundleno = 3 (0x3), region = 67 }
  0xcc   :  { %363 = vsyncpa [#allocation3], 1 }
  0xcd   :  { %365 = vsyncpa [#allocation3 + $0x1], 1 }

</bundles_post_ra>
